<compile_context>
chip_gen: v6e
topology: v6e:2x2x1
jax: 0.10.0
libtpu: 0.0.40
codegen_flags: <defaults>
</compile_context>

<pallas_src>
import functools

import jax
import jax.numpy as jnp
from jax import lax
from jax.experimental import pallas as pl
from jax.experimental.pallas import tpu as pltpu


def _round_up(x, m):
    return ((x + m - 1) // m) * m


def _gather_params_kernel(idx_ref, mu_ref, log_sigma_ref,
                          mu_out_ref, sigma_out_ref, *, tb, n_rows):
    """Gather TB rows from the VMEM-resident tables into one (TB, H) block.

    idx_ref        : SMEM (B_pad,) int32, scalar-prefetched.
    mu_ref         : VMEM (N, H) parameter table (resident across grid steps).
    log_sigma_ref  : VMEM (N, H) parameter table (resident across grid steps).
    mu_out_ref     : VMEM (TB, H) output tile.
    sigma_out_ref  : VMEM (TB, H) output tile.
    """
    base = pl.program_id(0) * tb

    def body(r, carry):
        idx = idx_ref[base + r]
        idx = jnp.clip(idx, 0, n_rows - 1)          # no HW bounds check on VMEM
        mu_out_ref[pl.ds(r, 1), :] = mu_ref[pl.ds(idx, 1), :]
        ls_row = log_sigma_ref[pl.ds(idx, 1), :].astype(jnp.float32)
        sigma_out_ref[pl.ds(r, 1), :] = jnp.exp(ls_row).astype(sigma_out_ref.dtype)
        return carry

    lax.fori_loop(0, tb, body, 0, unroll=(tb <= 32))


def variational_params_forward(X, indexes, mu, log_sigma):
    # The PyTorch forward raises NotImplementedError; this is the canonical
    # per-index variational-parameter gather. X is unused because __init__
    # defines no layers operating on it.
    del X
    B = int(indexes.shape[0])
    N, H = mu.shape

    # Batch tile: multiple of 8 sublanes, capped so VMEM stays small.
    TB = min(_round_up(B, 8), 128)
    B_pad = _round_up(B, TB)
    nb = B_pad // TB

    idx = jnp.asarray(indexes, jnp.int32)
    if B_pad != B:
        idx = jnp.concatenate([idx, jnp.zeros((B_pad - B,), jnp.int32)])

    kernel = functools.partial(_gather_params_kernel, tb=TB, n_rows=N)

    grid_spec = pltpu.PrefetchScalarGridSpec(
        num_scalar_prefetch=1,
        grid=(nb,),
        in_specs=[
            # Full tables, same block every step -> loaded once, VMEM-resident.
            pl.BlockSpec((N, H), lambda i, idx_ref: (0, 0)),
            pl.BlockSpec((N, H), lambda i, idx_ref: (0, 0)),
        ],
        out_specs=[
            # Sublane-aligned, lane-dense output tiles.
            pl.BlockSpec((TB, H), lambda i, idx_ref: (i, 0)),
            pl.BlockSpec((TB, H), lambda i, idx_ref: (i, 0)),
        ],
    )

    mu_p, sigma_p = pl.pallas_call(
        kernel,
        grid_spec=grid_spec,
        out_shape=(
            jax.ShapeDtypeStruct((B_pad, H), mu.dtype),
            jax.ShapeDtypeStruct((B_pad, H), log_sigma.dtype),
        ),
        compiler_params=pltpu.CompilerParams(
            dimension_semantics=("parallel",)),
    )(idx, mu, log_sigma)

    if B_pad != B:
        mu_p = mu_p[:B]
        sigma_p = sigma_p[:B]
    return mu_p, sigma_p


if __name__ == "__main__":
    # Small, module-consistent sizes: N datapoints, D observed dim, H latent dim.
    N, D, H = 16, 32, 128
    B = 8  # batch of indexes

    key = jax.random.PRNGKey(0)
    k_mu, k_ls, k_x, k_idx = jax.random.split(key, 4)

    # Deterministic in-script parameter initialization (no checkpoint load).
    mu = 0.01 * jax.random.normal(k_mu, (N, H), dtype=jnp.float32)
    log_sigma = -1.0 + 0.01 * jax.random.normal(k_ls, (N, H), dtype=jnp.float32)

    X = jax.random.normal(k_x, (B, D), dtype=jnp.float32)
    indexes = jax.random.randint(k_idx, (B,), 0, N, dtype=jnp.int32)

    mu_b, sigma_b = variational_params_forward(X, indexes, mu, log_sigma)
    jax.block_until_ready((mu_b, sigma_b))

    # Reference check in plain JAX.
    ref_mu = mu[indexes]
    ref_sigma = jnp.exp(log_sigma[indexes])
    assert mu_b.shape == (B, H) and sigma_b.shape == (B, H)
    assert jnp.allclose(mu_b, ref_mu, atol=1e-6), "mu gather mismatch"
    assert jnp.allclose(sigma_b, ref_sigma, atol=1e-6), "sigma mismatch"

    print("KERNEL_OK")
</pallas_src>

<mosaic_0001>
module attributes {stable_mosaic.version = 11 : i64} {
  func.func @_gather_params_kernel(%arg0: i32, %arg1: memref<8xi32, #tpu.memory_space<smem>>, %arg2: memref<16x128xf32, #tpu.memory_space<vmem>>, %arg3: memref<16x128xf32, #tpu.memory_space<vmem>>, %arg4: memref<8x128xf32, #tpu.memory_space<vmem>>, %arg5: memref<8x128xf32, #tpu.memory_space<vmem>>) attributes {dimension_semantics = [#tpu.dimension_semantics<parallel>], iteration_bounds = array<i64: 1>, scalar_prefetch = 1 : i64, scratch_operands = 0 : i64, tpu.core_type = #tpu.core_type<tc>, window_params = [{pipeline_mode = #tpu.pipeline_mode<synchronous>, transform_indices = @transform_0, window_bounds = array<i64: 16, 128>}, {pipeline_mode = #tpu.pipeline_mode<synchronous>, transform_indices = @transform_1, window_bounds = array<i64: 16, 128>}, {transform_indices = @transform_2, window_bounds = array<i64: 8, 128>}, {transform_indices = @transform_3, window_bounds = array<i64: 8, 128>}]} {
    %c8_i32 = arith.constant 8 : i32
    %0 = arith.muli %arg0, %c8_i32 : i32
    %c0_i32 = arith.constant 0 : i32
    %1 = arith.addi %0, %c0_i32 : i32
    %2 = arith.index_cast %1 : i32 to index
    %3 = memref.load %arg1[%2] : memref<8xi32, #tpu.memory_space<smem>>
    %c0_i32_0 = arith.constant 0 : i32
    %c15_i32 = arith.constant 15 : i32
    %4 = arith.maxsi %c0_i32_0, %3 : i32
    %5 = arith.minsi %c15_i32, %4 : i32
    %6 = arith.index_cast %5 : i32 to index
    %c0 = arith.constant 0 : index
    %7 = vector.load %arg2[%6, %c0] : memref<16x128xf32, #tpu.memory_space<vmem>>, vector<1x128xf32>
    %8 = arith.index_cast %c0_i32 : i32 to index
    %c0_1 = arith.constant 0 : index
    %9 = vector.load %arg4[%8, %c0_1] : memref<8x128xf32, #tpu.memory_space<vmem>>, vector<1x128xf32>
    tpu.vector_store %arg4[%8, %c0_1], %7 {strides = array<i32>} : memref<8x128xf32, #tpu.memory_space<vmem>>, vector<1x128xf32>,
    %10 = arith.index_cast %5 : i32 to index
    %c0_2 = arith.constant 0 : index
    %11 = vector.load %arg3[%10, %c0_2] : memref<16x128xf32, #tpu.memory_space<vmem>>, vector<1x128xf32>
    %12 = math.exp %11 : vector<1x128xf32>
    %13 = arith.index_cast %c0_i32 : i32 to index
    %c0_3 = arith.constant 0 : index
    %14 = vector.load %arg5[%13, %c0_3] : memref<8x128xf32, #tpu.memory_space<vmem>>, vector<1x128xf32>
    tpu.vector_store %arg5[%13, %c0_3], %12 {strides = array<i32>} : memref<8x128xf32, #tpu.memory_space<vmem>>, vector<1x128xf32>,
    %c1_i32 = arith.constant 1 : i32
    %15 = arith.addi %0, %c1_i32 : i32
    %16 = arith.index_cast %15 : i32 to index
    %17 = memref.load %arg1[%16] : memref<8xi32, #tpu.memory_space<smem>>
    %c0_i32_4 = arith.constant 0 : i32
    %c15_i32_5 = arith.constant 15 : i32
    %18 = arith.maxsi %c0_i32_4, %17 : i32
    %19 = arith.minsi %c15_i32_5, %18 : i32
    %20 = arith.index_cast %19 : i32 to index
    %c0_6 = arith.constant 0 : index
    %21 = vector.load %arg2[%20, %c0_6] : memref<16x128xf32, #tpu.memory_space<vmem>>, vector<1x128xf32>
    %22 = arith.index_cast %c1_i32 : i32 to index
    %c0_7 = arith.constant 0 : index
    %23 = vector.load %arg4[%22, %c0_7] : memref<8x128xf32, #tpu.memory_space<vmem>>, vector<1x128xf32>
    tpu.vector_store %arg4[%22, %c0_7], %21 {strides = array<i32>} : memref<8x128xf32, #tpu.memory_space<vmem>>, vector<1x128xf32>,
    %24 = arith.index_cast %19 : i32 to index
    %c0_8 = arith.constant 0 : index
    %25 = vector.load %arg3[%24, %c0_8] : memref<16x128xf32, #tpu.memory_space<vmem>>, vector<1x128xf32>
    %26 = math.exp %25 : vector<1x128xf32>
    %27 = arith.index_cast %c1_i32 : i32 to index
    %c0_9 = arith.constant 0 : index
    %28 = vector.load %arg5[%27, %c0_9] : memref<8x128xf32, #tpu.memory_space<vmem>>, vector<1x128xf32>
    tpu.vector_store %arg5[%27, %c0_9], %26 {strides = array<i32>} : memref<8x128xf32, #tpu.memory_space<vmem>>, vector<1x128xf32>,
    %c2_i32 = arith.constant 2 : i32
    %29 = arith.addi %0, %c2_i32 : i32
    %30 = arith.index_cast %29 : i32 to index
    %31 = memref.load %arg1[%30] : memref<8xi32, #tpu.memory_space<smem>>
    %c0_i32_10 = arith.constant 0 : i32
    %c15_i32_11 = arith.constant 15 : i32
    %32 = arith.maxsi %c0_i32_10, %31 : i32
    %33 = arith.minsi %c15_i32_11, %32 : i32
    %34 = arith.index_cast %33 : i32 to index
    %c0_12 = arith.constant 0 : index
    %35 = vector.load %arg2[%34, %c0_12] : memref<16x128xf32, #tpu.memory_space<vmem>>, vector<1x128xf32>
    %36 = arith.index_cast %c2_i32 : i32 to index
    %c0_13 = arith.constant 0 : index
    %37 = vector.load %arg4[%36, %c0_13] : memref<8x128xf32, #tpu.memory_space<vmem>>, vector<1x128xf32>
    tpu.vector_store %arg4[%36, %c0_13], %35 {strides = array<i32>} : memref<8x128xf32, #tpu.memory_space<vmem>>, vector<1x128xf32>,
    %38 = arith.index_cast %33 : i32 to index
    %c0_14 = arith.constant 0 : index
    %39 = vector.load %arg3[%38, %c0_14] : memref<16x128xf32, #tpu.memory_space<vmem>>, vector<1x128xf32>
    %40 = math.exp %39 : vector<1x128xf32>
    %41 = arith.index_cast %c2_i32 : i32 to index
    %c0_15 = arith.constant 0 : index
    %42 = vector.load %arg5[%41, %c0_15] : memref<8x128xf32, #tpu.memory_space<vmem>>, vector<1x128xf32>
    tpu.vector_store %arg5[%41, %c0_15], %40 {strides = array<i32>} : memref<8x128xf32, #tpu.memory_space<vmem>>, vector<1x128xf32>,
    %c3_i32 = arith.constant 3 : i32
    %43 = arith.addi %0, %c3_i32 : i32
    %44 = arith.index_cast %43 : i32 to index
    %45 = memref.load %arg1[%44] : memref<8xi32, #tpu.memory_space<smem>>
    %c0_i32_16 = arith.constant 0 : i32
    %c15_i32_17 = arith.constant 15 : i32
    %46 = arith.maxsi %c0_i32_16, %45 : i32
    %47 = arith.minsi %c15_i32_17, %46 : i32
    %48 = arith.index_cast %47 : i32 to index
    %c0_18 = arith.constant 0 : index
    %49 = vector.load %arg2[%48, %c0_18] : memref<16x128xf32, #tpu.memory_space<vmem>>, vector<1x128xf32>
    %50 = arith.index_cast %c3_i32 : i32 to index
    %c0_19 = arith.constant 0 : index
    %51 = vector.load %arg4[%50, %c0_19] : memref<8x128xf32, #tpu.memory_space<vmem>>, vector<1x128xf32>
    tpu.vector_store %arg4[%50, %c0_19], %49 {strides = array<i32>} : memref<8x128xf32, #tpu.memory_space<vmem>>, vector<1x128xf32>,
    %52 = arith.index_cast %47 : i32 to index
    %c0_20 = arith.constant 0 : index
    %53 = vector.load %arg3[%52, %c0_20] : memref<16x128xf32, #tpu.memory_space<vmem>>, vector<1x128xf32>
    %54 = math.exp %53 : vector<1x128xf32>
    %55 = arith.index_cast %c3_i32 : i32 to index
    %c0_21 = arith.constant 0 : index
    %56 = vector.load %arg5[%55, %c0_21] : memref<8x128xf32, #tpu.memory_space<vmem>>, vector<1x128xf32>
    tpu.vector_store %arg5[%55, %c0_21], %54 {strides = array<i32>} : memref<8x128xf32, #tpu.memory_space<vmem>>, vector<1x128xf32>,
    %c4_i32 = arith.constant 4 : i32
    %57 = arith.addi %0, %c4_i32 : i32
    %58 = arith.index_cast %57 : i32 to index
    %59 = memref.load %arg1[%58] : memref<8xi32, #tpu.memory_space<smem>>
    %c0_i32_22 = arith.constant 0 : i32
    %c15_i32_23 = arith.constant 15 : i32
    %60 = arith.maxsi %c0_i32_22, %59 : i32
    %61 = arith.minsi %c15_i32_23, %60 : i32
    %62 = arith.index_cast %61 : i32 to index
    %c0_24 = arith.constant 0 : index
    %63 = vector.load %arg2[%62, %c0_24] : memref<16x128xf32, #tpu.memory_space<vmem>>, vector<1x128xf32>
    %64 = arith.index_cast %c4_i32 : i32 to index
    %c0_25 = arith.constant 0 : index
    %65 = vector.load %arg4[%64, %c0_25] : memref<8x128xf32, #tpu.memory_space<vmem>>, vector<1x128xf32>
    tpu.vector_store %arg4[%64, %c0_25], %63 {strides = array<i32>} : memref<8x128xf32, #tpu.memory_space<vmem>>, vector<1x128xf32>,
    %66 = arith.index_cast %61 : i32 to index
    %c0_26 = arith.constant 0 : index
    %67 = vector.load %arg3[%66, %c0_26] : memref<16x128xf32, #tpu.memory_space<vmem>>, vector<1x128xf32>
    %68 = math.exp %67 : vector<1x128xf32>
    %69 = arith.index_cast %c4_i32 : i32 to index
    %c0_27 = arith.constant 0 : index
    %70 = vector.load %arg5[%69, %c0_27] : memref<8x128xf32, #tpu.memory_space<vmem>>, vector<1x128xf32>
    tpu.vector_store %arg5[%69, %c0_27], %68 {strides = array<i32>} : memref<8x128xf32, #tpu.memory_space<vmem>>, vector<1x128xf32>,
    %c5_i32 = arith.constant 5 : i32
    %71 = arith.addi %0, %c5_i32 : i32
    %72 = arith.index_cast %71 : i32 to index
    %73 = memref.load %arg1[%72] : memref<8xi32, #tpu.memory_space<smem>>
    %c0_i32_28 = arith.constant 0 : i32
    %c15_i32_29 = arith.constant 15 : i32
    %74 = arith.maxsi %c0_i32_28, %73 : i32
    %75 = arith.minsi %c15_i32_29, %74 : i32
    %76 = arith.index_cast %75 : i32 to index
    %c0_30 = arith.constant 0 : index
    %77 = vector.load %arg2[%76, %c0_30] : memref<16x128xf32, #tpu.memory_space<vmem>>, vector<1x128xf32>
    %78 = arith.index_cast %c5_i32 : i32 to index
    %c0_31 = arith.constant 0 : index
    %79 = vector.load %arg4[%78, %c0_31] : memref<8x128xf32, #tpu.memory_space<vmem>>, vector<1x128xf32>
    tpu.vector_store %arg4[%78, %c0_31], %77 {strides = array<i32>} : memref<8x128xf32, #tpu.memory_space<vmem>>, vector<1x128xf32>,
    %80 = arith.index_cast %75 : i32 to index
    %c0_32 = arith.constant 0 : index
    %81 = vector.load %arg3[%80, %c0_32] : memref<16x128xf32, #tpu.memory_space<vmem>>, vector<1x128xf32>
    %82 = math.exp %81 : vector<1x128xf32>
    %83 = arith.index_cast %c5_i32 : i32 to index
    %c0_33 = arith.constant 0 : index
    %84 = vector.load %arg5[%83, %c0_33] : memref<8x128xf32, #tpu.memory_space<vmem>>, vector<1x128xf32>
    tpu.vector_store %arg5[%83, %c0_33], %82 {strides = array<i32>} : memref<8x128xf32, #tpu.memory_space<vmem>>, vector<1x128xf32>,
    %c6_i32 = arith.constant 6 : i32
    %85 = arith.addi %0, %c6_i32 : i32
    %86 = arith.index_cast %85 : i32 to index
    %87 = memref.load %arg1[%86] : memref<8xi32, #tpu.memory_space<smem>>
    %c0_i32_34 = arith.constant 0 : i32
    %c15_i32_35 = arith.constant 15 : i32
    %88 = arith.maxsi %c0_i32_34, %87 : i32
    %89 = arith.minsi %c15_i32_35, %88 : i32
    %90 = arith.index_cast %89 : i32 to index
    %c0_36 = arith.constant 0 : index
    %91 = vector.load %arg2[%90, %c0_36] : memref<16x128xf32, #tpu.memory_space<vmem>>, vector<1x128xf32>
    %92 = arith.index_cast %c6_i32 : i32 to index
    %c0_37 = arith.constant 0 : index
    %93 = vector.load %arg4[%92, %c0_37] : memref<8x128xf32, #tpu.memory_space<vmem>>, vector<1x128xf32>
    tpu.vector_store %arg4[%92, %c0_37], %91 {strides = array<i32>} : memref<8x128xf32, #tpu.memory_space<vmem>>, vector<1x128xf32>,
    %94 = arith.index_cast %89 : i32 to index
    %c0_38 = arith.constant 0 : index
    %95 = vector.load %arg3[%94, %c0_38] : memref<16x128xf32, #tpu.memory_space<vmem>>, vector<1x128xf32>
    %96 = math.exp %95 : vector<1x128xf32>
    %97 = arith.index_cast %c6_i32 : i32 to index
    %c0_39 = arith.constant 0 : index
    %98 = vector.load %arg5[%97, %c0_39] : memref<8x128xf32, #tpu.memory_space<vmem>>, vector<1x128xf32>
    tpu.vector_store %arg5[%97, %c0_39], %96 {strides = array<i32>} : memref<8x128xf32, #tpu.memory_space<vmem>>, vector<1x128xf32>,
    %c7_i32 = arith.constant 7 : i32
    %99 = arith.addi %0, %c7_i32 : i32
    %100 = arith.index_cast %99 : i32 to index
    %101 = memref.load %arg1[%100] : memref<8xi32, #tpu.memory_space<smem>>
    %c0_i32_40 = arith.constant 0 : i32
    %c15_i32_41 = arith.constant 15 : i32
    %102 = arith.maxsi %c0_i32_40, %101 : i32
    %103 = arith.minsi %c15_i32_41, %102 : i32
    %104 = arith.index_cast %103 : i32 to index
    %c0_42 = arith.constant 0 : index
    %105 = vector.load %arg2[%104, %c0_42] : memref<16x128xf32, #tpu.memory_space<vmem>>, vector<1x128xf32>
    %106 = arith.index_cast %c7_i32 : i32 to index
    %c0_43 = arith.constant 0 : index
    %107 = vector.load %arg4[%106, %c0_43] : memref<8x128xf32, #tpu.memory_space<vmem>>, vector<1x128xf32>
    tpu.vector_store %arg4[%106, %c0_43], %105 {strides = array<i32>} : memref<8x128xf32, #tpu.memory_space<vmem>>, vector<1x128xf32>,
    %108 = arith.index_cast %103 : i32 to index
    %c0_44 = arith.constant 0 : index
    %109 = vector.load %arg3[%108, %c0_44] : memref<16x128xf32, #tpu.memory_space<vmem>>, vector<1x128xf32>
    %110 = math.exp %109 : vector<1x128xf32>
    %111 = arith.index_cast %c7_i32 : i32 to index
    %c0_45 = arith.constant 0 : index
    %112 = vector.load %arg5[%111, %c0_45] : memref<8x128xf32, #tpu.memory_space<vmem>>, vector<1x128xf32>
    tpu.vector_store %arg5[%111, %c0_45], %110 {strides = array<i32>} : memref<8x128xf32, #tpu.memory_space<vmem>>, vector<1x128xf32>,
    %c8_i32_46 = arith.constant 8 : i32
    return
  }
  func.func @transform_0(%arg0: i32, %arg1: memref<8xi32, #tpu.memory_space<smem>>) -> (i32, i32) {
    %c0_i32 = arith.constant 0 : i32
    %c0_i32_0 = arith.constant 0 : i32
    %c0_i32_1 = arith.constant 0 : i32
    return %c0_i32, %c0_i32_0 : i32, i32
  }
  func.func @transform_1(%arg0: i32, %arg1: memref<8xi32, #tpu.memory_space<smem>>) -> (i32, i32) {
    %c0_i32 = arith.constant 0 : i32
    %c0_i32_0 = arith.constant 0 : i32
    %c0_i32_1 = arith.constant 0 : i32
    return %c0_i32, %c0_i32_0 : i32, i32
  }
  func.func @transform_2(%arg0: i32, %arg1: memref<8xi32, #tpu.memory_space<smem>>) -> (i32, i32) {
    %c0_i32 = arith.constant 0 : i32
    %c0_i32_0 = arith.constant 0 : i32
    return %arg0, %c0_i32 : i32, i32
  }
  func.func @transform_3(%arg0: i32, %arg1: memref<8xi32, #tpu.memory_space<smem>>) -> (i32, i32) {
    %c0_i32 = arith.constant 0 : i32
    %c0_i32_0 = arith.constant 0 : i32
    return %arg0, %c0_i32 : i32, i32
  }
}

</mosaic_0001>

<bundles_post_ra>
// kernel: tpu_custom_call.1
= control target key start
LH: loop header
LB: loop body
LE: loop exit
PB: predicated region body
PF: predicated region fallthrough
CT: control target
= control target key end

     0   :  { %s390_s15 = smov [#allocation3]   ;;  %s464_s0 = inlined_call_operand.hbm [shape: s32[8], index: 0, kind: input, shape index: {}]   ;;  %s465_s1 = inlined_call_operand.hbm [shape: f32[16,128], index: 1, kind: input, shape index: {}]   ;;  %s466_s2 = inlined_call_operand.hbm [shape: f32[16,128], index: 2, kind: input, shape index: {}]   ;;  %s467_s3 = inlined_call_operand.hbm [shape: f32[8,128], index: 3, kind: output, shape index: {0}]   ;;  %s468_s4 = inlined_call_operand.hbm [shape: f32[8,128], index: 4, kind: output, shape index: {1}]  }
   0x1   :  { %11 = dma.hbm_to_smem %s464_s0, 16, %s390_s15, [#allocation2] }
   0x2   :  { %380 = dma.done.wait [#allocation2], 16 }
   0x3   :  { %381 = vsyncadd [#allocation2], 4294967280 }
   0x4   :  { %13 = sfence }
   0x5   :  { %14 = vsyncpa [#allocation5], 0 }
   0x6   :  { %15 = vsyncpa [#allocation8], 0 }
   0x7   :  { %16 = vsyncpa [#allocation6], 0 }
   0x8   :  { %17 = vsyncpa [#allocation11], 0  ;;  %s391_s18 = smov [#allocation4]  }
   0x9   :  { %s23_s19 = sshll.u32 %s391_s18, 4  ;;  %s24_s19 = int_to_ptr.vmem [resolvable:$true] %s23_s19 }
   0xa   :  { %s308_s20 = scalar_lea.vmem %s24_s19, 256  ;;  %p313_p1 = scmp.lt.s32.totalorder %s24_s19, %s24_s19 }
   0xb   :  { %p309_p0 = scmp.ne.s32.totalorder %s24_s19, %s308_s20  ;;  %p314_p2 = scmp.lt.s32.totalorder %s308_s20, %s308_s20 }
   0xd   :  { %p315_p3 = por %p314_p2, %p313_p1 }
   0xf   :  { %p316_p4 = pnand %p315_p3, %p309_p0 }
  0x11   :  { %319 = shalt.err (!%p316_p4)
}
  0x12   :  { %s392_s21 = smov 128   ;;  %s393_s22 = smov 8  }
  0x13   :  { %29 = dma.hbm_to_vmem [thread:$0]  %s465_s1, 256, %s24_s19, [#allocation5], %s392_s21, %s392_s21, %s393_s22  }
  0x14   :  { %s394_s24 = smov [#allocation7]  }
  0x15   :  { %s35_s25 = sshll.u32 %s394_s24, 4  ;;  %s36_s25 = int_to_ptr.vmem [resolvable:$true] %s35_s25 }
  0x16   :  { %s328_s26 = scalar_lea.vmem %s36_s25, 256  ;;  %p333_p6 = scmp.lt.s32.totalorder %s36_s25, %s36_s25 }
  0x17   :  { %p329_p5 = scmp.ne.s32.totalorder %s36_s25, %s328_s26  ;;  %p334_p7 = scmp.lt.s32.totalorder %s328_s26, %s328_s26 }
  0x19   :  { %p335_p8 = por %p334_p7, %p333_p6 }
  0x1b   :  { %p336_p9 = pnand %p335_p8, %p329_p5 }
  0x1d   :  { %339 = shalt.err (!%p336_p9)
}
  0x1e   :  { %41 = dma.hbm_to_vmem [thread:$0]  %s466_s2, 256, %s36_s25, [#allocation8], %s392_s21, %s392_s21, %s393_s22  }
  0x1f   :  { %382 = dma.done.wait [#allocation5], 256  }
  0x20   :  { %383 = vsyncadd [#allocation5], 4294967040 }
  0x21   :  { %384 = dma.done.wait [#allocation8], 256  }
  0x22   :  { %385 = vsyncadd [#allocation8], 4294967040  ;;  %s49_s29 = sld [smem:[#allocation3]]  ;;  %s395_s21 = smov [#allocation9]  }
  0x23   :  { %s211_s1 = sld [smem:[#allocation3 + $0x1]]  ;;  %s166_s22 = sshll.u32 %s395_s21, 4  ;;  %s451_s22 = int_to_ptr.vmem [resolvable:$true] %s166_s22 }
  0x24   :  { %s431_s30 = sld [smem:[#allocation3 + $0x2]]  ;;  %s340_s26 = scalar_lea.vmem %s451_s22, 128 }
  0x25   :  { %s433_s5 = sld [smem:[#allocation3 + $0x3]] }
  0x26   :  { %s435_s6 = sld [smem:[#allocation3 + $0x4]] }
  0x27   :  { %s437_s7 = sld [smem:[#allocation3 + $0x5]] }
  0x28   :  { %p50_p10 = scmp.gt.s32.totalorder %s49_s29, 0  ;;  %p206_p11 = scmp.lt.s32.totalorder %s49_s29, 15 }
  0x29   :  { %p64_p12 = scmp.gt.s32.totalorder %s211_s1, 0  ;;  %p212_p13 = scmp.lt.s32.totalorder %s211_s1, 15 }
  0x2a   :  { %s470_s29 = smov (!%p50_p10, %s49_s29), 0  ;;  %p78_p0 = scmp.gt.s32.totalorder %s431_s30, 0 }
  0x2b   :  { %s472_s1 = smov (!%p64_p12, %s211_s1), 0  ;;  %s474_s29 = smov (!%p206_p11, %s470_s29), 15 }
  0x2c   :  { %s476_s1 = smov (!%p212_p13, %s472_s1), 15  ;;  %s54_s2 = scalar_lea.vmem [#allocation4], %s474_s29 }
  0x2d   :  { %v55_v0 = vld [vmem:[%s54_s2] sm:$0x1]  ;;  %s57_s8 = scalar_lea.vmem [#allocation7], %s474_s29  ;;  %s68_s9 = scalar_lea.vmem [#allocation4], %s476_s1 }
  0x2e   :  { %v58_v1 = vld [vmem:[%s57_s8] sm:$0x1]  ;;  %56 = vst [vmem:[#allocation9] sm:$0x1] %v55_v0  ;;  %s71_s10 = scalar_lea.vmem [#allocation7], %s476_s1  ;;  %p218_p1 = scmp.lt.s32.totalorder %s431_s30, 15 }
  0x2f   :  { %v59_v2 = vmul.f32 1.442695, %v58_v1  ;;  %v69_v3 = vld [vmem:[%s68_s9] sm:$0x1]  ;;  %p92_p2 = scmp.gt.s32.totalorder %s433_s5, 0  ;;  %p224_p3 = scmp.lt.s32.totalorder %s433_s5, 15 }
  0x30   :  { %v72_v4 = vld [vmem:[%s71_s10] sm:$0x1]  ;;  %70 = vst [vmem:[#allocation9 + $0x1] sm:$0x1] %v69_v3  ;;  %s478_s30 = smov (!%p78_p0, %s431_s30), 0  ;;  %p106_p4 = scmp.gt.s32.totalorder %s435_s6, 0 }
  0x31   :  { %v73_v5 = vmul.f32 1.442695, %v72_v4  ;;  %276 = vpow2.f32 %v59_v2  ;;  %s480_s5 = smov (!%p92_p2, %s433_s5), 0  ;;  %s482_s30 = smov (!%p218_p1, %s478_s30), 15 }
  0x32   :  { %s484_s5 = smov (!%p224_p3, %s480_s5), 15  ;;  %s82_s11 = scalar_lea.vmem [#allocation4], %s482_s30 }
  0x33   :  { %278 = vpow2.f32 %v73_v5  ;;  %v83_v6 = vld [vmem:[%s82_s11] sm:$0x1]  ;;  %s85_s12 = scalar_lea.vmem [#allocation7], %s482_s30  ;;  %s96_s13 = scalar_lea.vmem [#allocation4], %s484_s5 }
  0x34   :  { %v86_v7 = vld [vmem:[%s85_s12] sm:$0x1]  ;;  %84 = vst [vmem:[#allocation9 + $0x2] sm:$0x1] %v83_v6  ;;  %s99_s14 = scalar_lea.vmem [#allocation7], %s484_s5  ;;  %p230_p5 = scmp.lt.s32.totalorder %s435_s6, 15 }
  0x35   :  { %v87_v8 = vmul.f32 1.442695, %v86_v7  ;;  %v97_v9 = vld [vmem:[%s96_s13] sm:$0x1]  ;;  %p120_p6 = scmp.gt.s32.totalorder %s437_s7, 0  ;;  %p236_p7 = scmp.lt.s32.totalorder %s437_s7, 15 }
  0x36   :  { %v100_v10 = vld [vmem:[%s99_s14] sm:$0x1]  ;;  %98 = vst [vmem:[#allocation9 + $0x3] sm:$0x1] %v97_v9  ;;  %s486_s6 = smov (!%p106_p4, %s435_s6), 0  ;;  %s241_s19 = sld [smem:[#allocation3 + $0x6]] }
  0x37   :  { %v101_v11 = vmul.f32 1.442695, %v100_v10  ;;  %280 = vpow2.f32 %v87_v8  ;;  %s488_s7 = smov (!%p120_p6, %s437_s7), 0  ;;  %s490_s6 = smov (!%p230_p5, %s486_s6), 15 }
  0x38   :  { %s492_s7 = smov (!%p236_p7, %s488_s7), 15  ;;  %s110_s15 = scalar_lea.vmem [#allocation4], %s490_s6 }
  0x39   :  { %282 = vpow2.f32 %v101_v11  ;;  %v111_v14 = vld [vmem:[%s110_s15] sm:$0x1]  ;;  %s113_s16 = scalar_lea.vmem [#allocation7], %s490_s6  ;;  %s124_s17 = scalar_lea.vmem [#allocation4], %s492_s7 }
  0x3a   :  { %v114_v15 = vld [vmem:[%s113_s16] sm:$0x1]  ;;  %112 = vst [vmem:[#allocation9 + $0x4] sm:$0x1] %v111_v14  ;;  %s127_s18 = scalar_lea.vmem [#allocation7], %s492_s7  ;;  %s247_s20 = sld [smem:[#allocation3 + $0x7]] }
  0x3b   :  { %v115_v16 = vmul.f32 1.442695, %v114_v15  ;;  %v125_v17 = vld [vmem:[%s124_s17] sm:$0x1]  ;;  %p341_p12 = scmp.ne.s32.totalorder %s451_s22, %s340_s26  ;;  %p345_p13 = scmp.lt.s32.totalorder %s451_s22, %s451_s22 }
  0x3c   :  { %v128_v18 = vld [vmem:[%s127_s18] sm:$0x1]  ;;  %126 = vst [vmem:[#allocation9 + $0x5] sm:$0x1] %v125_v17  ;;  %p134_p8 = scmp.gt.s32.totalorder %s241_s19, 0  ;;  %p242_p9 = scmp.lt.s32.totalorder %s241_s19, 15 }
  0x3d   :  { %v129_v19 = vmul.f32 1.442695, %v128_v18  ;;  %284 = vpow2.f32 %v115_v16  ;;  %p346_p0 = scmp.lt.s32.totalorder %s340_s26, %s340_s26 }
  0x3e   :  { %v277_v12 = vpop.eup %276  ;;  %s494_s19 = smov (!%p134_p8, %s241_s19), 0 }
  0x3f   :  { %61 = vst [vmem:[#allocation10] sm:$0x1] %v277_v12  ;;  %286 = vpow2.f32 %v129_v19  ;;  %s498_s19 = smov (!%p242_p9, %s494_s19), 15  ;;  %p347_p1 = por %p346_p0, %p345_p13 }
  0x40   :  { %v279_v13 = vpop.eup %278  ;;  %p148_p10 = scmp.gt.s32.totalorder %s247_s20, 0  ;;  %p248_p11 = scmp.lt.s32.totalorder %s247_s20, 15 }
  0x41   :  { %75 = vst [vmem:[#allocation10 + $0x1] sm:$0x1] %v279_v13  ;;  %s138_s0 = scalar_lea.vmem [#allocation4], %s498_s19  ;;  %s141_s23 = scalar_lea.vmem [#allocation7], %s498_s19 }
  0x42   :  { %s496_s20 = smov (!%p148_p10, %s247_s20), 0  ;;  %v139_v22 = vld [vmem:[%s138_s0] sm:$0x1]  ;;  %p348_p2 = pnand %p347_p1, %p341_p12 }
  0x43   :  { %s500_s20 = smov (!%p248_p11, %s496_s20), 15  ;;  %v142_v23 = vld [vmem:[%s141_s23] sm:$0x1]  ;;  %140 = vst [vmem:[#allocation9 + $0x6] sm:$0x1] %v139_v22 }
  0x44   :  { %v281_v20 = vpop.eup %280  ;;  %v143_v25 = vmul.f32 1.442695, %v142_v23  ;;  %s152_s24 = scalar_lea.vmem [#allocation4], %s500_s20  ;;  %s155_s25 = scalar_lea.vmem [#allocation7], %s500_s20 }
  0x45   :  { %89 = vst [vmem:[#allocation10 + $0x2] sm:$0x1] %v281_v20  ;;  %v153_v26 = vld [vmem:[%s152_s24] sm:$0x1] }
  0x46   :  { %v283_v21 = vpop.eup %282  ;;  %v156_v27 = vld [vmem:[%s155_s25] sm:$0x1]  ;;  %154 = vst [vmem:[#allocation9 + $0x7] sm:$0x1] %v153_v26  ;;  %288 = vpow2.f32 %v143_v25 }
  0x47   :  { %103 = vst [vmem:[#allocation10 + $0x3] sm:$0x1] %v283_v21  ;;  %v157_v29 = vmul.f32 1.442695, %v156_v27 }
  0x4a   :  { %v285_v24 = vpop.eup %284 }
  0x4b   :  { %117 = vst [vmem:[#allocation10 + $0x4] sm:$0x1] %v285_v24 }
  0x4c   :  { %v287_v28 = vpop.eup %286 }
  0x4d   :  { %131 = vst [vmem:[#allocation10 + $0x5] sm:$0x1] %v287_v28 }
  0x4e   :  { %351 = shalt.err (!%p348_p2)
}
  0x4f   :  { %169 = dma.vmem_to_hbm [thread:$0]  %s451_s22, 128, %s467_s3, [#allocation6]   ;;  %290 = vpow2.f32 %v157_v29 }
  0x50   :  { %s396_s29 = smov [#allocation10]  }
  0x51   :  { %s176_s1 = sshll.u32 %s396_s29, 4  ;;  %s177_s1 = int_to_ptr.vmem [resolvable:$true] %s176_s1 }
  0x52   :  { %s360_s30 = scalar_lea.vmem %s177_s1, 128  ;;  %p365_p4 = scmp.lt.s32.totalorder %s177_s1, %s177_s1 }
  0x53   :  { %v289_v30 = vpop.eup %288  ;;  %p361_p3 = scmp.ne.s32.totalorder %s177_s1, %s360_s30  ;;  %p366_p5 = scmp.lt.s32.totalorder %s360_s30, %s360_s30 }
  0x54   :  { %145 = vst [vmem:[#allocation10 + $0x6] sm:$0x1] %v289_v30 }
  0x55   :  { %p367_p6 = por %p366_p5, %p365_p4 }
  0x57   :  { %p368_p7 = pnand %p367_p6, %p361_p3 }
  0x5c   :  { %v291_v31 = vpop.eup %290 }
  0x5d   :  { %159 = vst [vmem:[#allocation10 + $0x7] sm:$0x1] %v291_v31 }
  0x5e   :  { %371 = shalt.err (!%p368_p7)
}
  0x5f   :  { %179 = dma.vmem_to_hbm [thread:$0]  %s177_s1, 128, %s468_s4, [#allocation11]  }
  0x60   :  { %386 = dma.done.wait [#allocation6], 128  }
  0x61   :  { %387 = vsyncadd [#allocation6], 4294967168 }
  0x62   :  { %388 = dma.done.wait [#allocation11], 128  }
  0x63   :  { %389 = vsyncadd [#allocation11], 4294967168 }
  0x64   :  { %186 = vsyncpa [#allocation5], 1 }
  0x65   :  { %187 = vsyncpa [#allocation8], 1 }
  0x66   :  { %188 = vsyncpa [#allocation6], 1 }
  0x67   :  { %189 = vsyncpa [#allocation11], 1 }

</bundles_post_ra>
